<compile_context>
chip_gen: v5e
topology: v5e:2x2
jax: 0.10.0
libtpu: 0.0.40
codegen_flags: <defaults>
</compile_context>

<pallas_src>
import functools
import math

import numpy as np
import jax
import jax.numpy as jnp
from jax.experimental import pallas as pl
from jax.experimental.pallas import tpu as pltpu

WINDOW_SIZE = 11
SIGMA = 1.5
C1 = 0.01 ** 2
C2 = 0.03 ** 2


@functools.lru_cache(maxsize=None)
def _gaussian_1d(window_size: int, sigma: float) -> np.ndarray:
    g = np.array(
        [math.exp(-((x - window_size // 2) ** 2) / (2.0 * sigma ** 2))
         for x in range(window_size)],
        dtype=np.float64)
    return g / g.sum()


@functools.lru_cache(maxsize=None)
def _banded_gaussian(n: int, window_size: int) -> np.ndarray:
    """(n, n) matrix M with M[i, r] = g[r - i + p]; M @ x == 'same' 1D conv."""
    g = _gaussian_1d(window_size, SIGMA)
    p = window_size // 2
    m = np.zeros((n, n), dtype=np.float64)
    for i in range(n):
        for t in range(window_size):
            r = i + t - p
            if 0 <= r < n:          # zero padding absorbed by clipping the band
                m[i, r] = g[t]
    return m.astype(np.float32)


@functools.lru_cache(maxsize=None)
def _block_matrices(H: int, W: int, S: int, window_size: int):
    """Block-diagonal banded matrices for the fused, lane-folded conv passes."""
    band_h = _banded_gaussian(H, window_size)            # (H, H), column pass
    band_w = _banded_gaussian(W, window_size)            # (W, W), row pass
    # Column pass applies to the 5 stacked quantities along sublanes: (5H, 5H).
    a5 = np.kron(np.eye(5, dtype=np.float32), band_h)
    # Row pass applies per slab folded into lanes: (S*W, S*W).
    bts = np.kron(np.eye(S, dtype=np.float32), band_w.T)
    return a5, bts


def _ssim_kernel(img1_ref, img2_ref, a5_ref, bts_ref, out_ref, *, S, H, W):
    # img1_ref / img2_ref : (1, H, S*W) f32, S (batch, channel) slabs folded into lanes.
    # a5_ref              : (5H, 5H) block-diag banded Gaussian (column pass, left).
    # bts_ref             : (S*W, S*W) block-diag banded Gaussian (row pass, right).
    # out_ref             : (1, 1, S*W) per-column sums of the SSIM map.
    x1 = img1_ref[0]                                     # (H, S*W)
    x2 = img2_ref[0]

    # Stack all five conv operands along sublanes -> one (5H, S*W) slab.
    z = jnp.concatenate([x1, x2, x1 * x1, x2 * x2, x1 * x2], axis=0)

    # Fused Gaussian blur for all 5 quantities x S slabs: two MXU matmuls total.
    zr = jnp.dot(z, bts_ref[...], preferred_element_type=jnp.float32)   # row pass
    c = jnp.dot(a5_ref[...], zr, preferred_element_type=jnp.float32)    # column pass

    mu1 = c[0 * H:1 * H]
    mu2 = c[1 * H:2 * H]
    s11 = c[2 * H:3 * H]
    s22 = c[3 * H:4 * H]
    s12 = c[4 * H:5 * H]

    mu1_sq = mu1 * mu1
    mu2_sq = mu2 * mu2
    mu1_mu2 = mu1 * mu2
    sigma1_sq = s11 - mu1_sq
    sigma2_sq = s22 - mu2_sq
    sigma12 = s12 - mu1_mu2

    num = (2.0 * mu1_mu2 + C1) * (2.0 * sigma12 + C2)
    den = (mu1_sq + mu2_sq + C1) * (sigma1_sq + sigma2_sq + C2)
    # Exact divide: approx EUP reciprocal can exceed tolerance in near-constant regions.
    ssim_map = num / den                                 # (H, S*W)

    # Reduce over H in-kernel; the tiny per-slab lane reduction finishes in the wrapper.
    out_ref[0] = jnp.sum(ssim_map, axis=0, keepdims=True)


@functools.partial(jax.jit, static_argnames=("window_size", "size_average"))
def ssim_pallas(img1, img2, window_size=WINDOW_SIZE, size_average=True):
    """SSIM(img1, img2) with a Gaussian window; mirrors the PyTorch SSIM module."""
    assert img1.shape == img2.shape
    B, C, H, W = img1.shape
    n_slabs = B * C

    # TODO(synk): for very large H/W the dense (H,H)/(W,W) banded matrices should
    # be replaced by strip-tiles with a 2*(window_size//2) halo (and
    # vmem_limit_bytes re-budgeted for v7x's 64 MiB VMEM); not needed here.
    # TODO(synk): if H % 8 != 0 in real workloads, pad H host-side to a multiple
    # of 8 so the in-kernel sublane slices stay tile-aligned.

    # Slabs per block: fold as many slabs into the 128-lane axis as fit, but
    # keep >= 2 grid blocks when possible so the "parallel" grid axis can shard
    # across both v7x TensorCores.
    S = max(1, min(n_slabs, 128 // W if W <= 128 else 1))
    if n_slabs >= 2 and -(-n_slabs // S) < 2:
        S = -(-n_slabs // 2)
    n_blocks = -(-n_slabs // S)
    pad_slabs = n_blocks * S - n_slabs

    x1 = img1.astype(jnp.float32).reshape(n_slabs, H, W)
    x2 = img2.astype(jnp.float32).reshape(n_slabs, H, W)
    if pad_slabs:
        x1 = jnp.pad(x1, ((0, pad_slabs), (0, 0), (0, 0)))
        x2 = jnp.pad(x2, ((0, pad_slabs), (0, 0), (0, 0)))

    # Lane-folded layout: (n_blocks, H, S*W) -> one lane-dense DMA block per step.
    def fold(x):
        return x.reshape(n_blocks, S, H, W).transpose(0, 2, 1, 3).reshape(
            n_blocks, H, S * W)

    x1 = fold(x1)
    x2 = fold(x2)

    a5_np, bts_np = _block_matrices(H, W, S, window_size)   # host-cached
    a5 = jnp.asarray(a5_np)                                 # constants under jit
    bts = jnp.asarray(bts_np)

    kernel = functools.partial(_ssim_kernel, S=S, H=H, W=W)

    out = pl.pallas_call(
        kernel,
        out_shape=jax.ShapeDtypeStruct((n_blocks, 1, S * W), jnp.float32),
        grid=(n_blocks,),
        in_specs=[
            pl.BlockSpec((1, H, S * W), lambda i: (i, 0, 0)),    # img1 slabs
            pl.BlockSpec((1, H, S * W), lambda i: (i, 0, 0)),    # img2 slabs
            pl.BlockSpec((5 * H, 5 * H), lambda i: (0, 0)),      # column-pass matrix
            pl.BlockSpec((S * W, S * W), lambda i: (0, 0)),      # row-pass matrix
        ],
        out_specs=pl.BlockSpec((1, 1, S * W), lambda i: (i, 0, 0)),
        compiler_params=pltpu.CompilerParams(
            dimension_semantics=("parallel",)),                  # independent per-block outputs
    )(x1, x2, a5, bts)

    # Finish the per-slab reduction (tiny, fused under jit); drop padded slabs.
    col_sums = out[:, 0, :].reshape(n_blocks * S, W)
    per_slab = jnp.sum(col_sums, axis=1)[:n_slabs] * (1.0 / float(H * W))
    if size_average:
        return jnp.mean(per_slab)
    return jnp.mean(per_slab.reshape(B, C), axis=1)


def _ssim_reference(img1, img2, window_size=WINDOW_SIZE, size_average=True):
    """Pure-JAX reference reproducing the PyTorch _ssim (f32-accurate conv)."""
    B, C, H, W = img1.shape
    g = _gaussian_1d(window_size, SIGMA).astype(np.float32)
    w2d = jnp.asarray(np.outer(g, g).astype(np.float32))
    w = jnp.broadcast_to(w2d, (C, 1, window_size, window_size))
    pad = window_size // 2

    def conv(x):
        return jax.lax.conv_general_dilated(
            x, w, window_strides=(1, 1), padding=[(pad, pad), (pad, pad)],
            feature_group_count=C,
            dimension_numbers=("NCHW", "OIHW", "NCHW"),
            precision=jax.lax.Precision.HIGHEST)

    mu1 = conv(img1)
    mu2 = conv(img2)
    mu1_sq, mu2_sq, mu1_mu2 = mu1 * mu1, mu2 * mu2, mu1 * mu2
    sigma1_sq = conv(img1 * img1) - mu1_sq
    sigma2_sq = conv(img2 * img2) - mu2_sq
    sigma12 = conv(img1 * img2) - mu1_mu2
    ssim_map = ((2 * mu1_mu2 + C1) * (2 * sigma12 + C2)) / (
        (mu1_sq + mu2_sq + C1) * (sigma1_sq + sigma2_sq + C2))
    if size_average:
        return jnp.mean(ssim_map)
    return jnp.mean(ssim_map, axis=(1, 2, 3))


if __name__ == "__main__":
    key = jax.random.PRNGKey(0)
    k1, k2 = jax.random.split(key)
    B, C, H, W = 2, 4, 16, 16
    img1 = jax.random.uniform(k1, (B, C, H, W), dtype=jnp.float32)
    noise = jax.random.uniform(k2, (B, C, H, W), dtype=jnp.float32)
    img2 = 0.8 * img1 + 0.2 * noise      # correlated pair -> SSIM well away from 0

    out = jax.block_until_ready(ssim_pallas(img1, img2))
    ref = jax.block_until_ready(_ssim_reference(img1, img2))
    # Tolerance leaves headroom for MXU multi-pass emulation of f32 matmuls.
    assert np.allclose(np.asarray(out), np.asarray(ref), atol=2e-3), (out, ref)

    out_b = jax.block_until_ready(ssim_pallas(img1, img2, size_average=False))
    ref_b = jax.block_until_ready(_ssim_reference(img1, img2, size_average=False))
    assert np.allclose(np.asarray(out_b), np.asarray(ref_b), atol=2e-3), (out_b, ref_b)

    print("KERNEL_OK")
</pallas_src>

<mosaic_0001>
module attributes {stable_mosaic.version = 11 : i64} {
  func.func @_ssim_kernel(%arg0: i32, %arg1: memref<1x16x64xf32, #tpu.memory_space<vmem>>, %arg2: memref<1x16x64xf32, #tpu.memory_space<vmem>>, %arg3: memref<80x80xf32, #tpu.memory_space<vmem>>, %arg4: memref<64x64xf32, #tpu.memory_space<vmem>>, %arg5: memref<1x1x64xf32, #tpu.memory_space<vmem>>) attributes {dimension_semantics = [#tpu.dimension_semantics<parallel>], iteration_bounds = array<i64: 2>, scalar_prefetch = 0 : i64, scratch_operands = 0 : i64, tpu.core_type = #tpu.core_type<tc>, window_params = [{transform_indices = @transform_0, window_bounds = array<i64: 1, 16, 64>}, {transform_indices = @transform_1, window_bounds = array<i64: 1, 16, 64>}, {pipeline_mode = #tpu.pipeline_mode<synchronous>, transform_indices = @transform_2, window_bounds = array<i64: 80, 80>}, {pipeline_mode = #tpu.pipeline_mode<synchronous>, transform_indices = @transform_3, window_bounds = array<i64: 64, 64>}, {transform_indices = @transform_4, window_bounds = array<i64: 1, 1, 64>}]} {
    %c0 = arith.constant 0 : index
    %c0_0 = arith.constant 0 : index
    %c0_1 = arith.constant 0 : index
    %0 = vector.load %arg1[%c0, %c0_0, %c0_1] : memref<1x16x64xf32, #tpu.memory_space<vmem>>, vector<1x16x64xf32>
    %1 = vector.shape_cast %0 : vector<1x16x64xf32> to vector<16x64xf32>
    %c0_2 = arith.constant 0 : index
    %c0_3 = arith.constant 0 : index
    %c0_4 = arith.constant 0 : index
    %2 = vector.load %arg2[%c0_2, %c0_3, %c0_4] : memref<1x16x64xf32, #tpu.memory_space<vmem>>, vector<1x16x64xf32>
    %3 = vector.shape_cast %2 : vector<1x16x64xf32> to vector<16x64xf32>
    %4 = arith.mulf %1, %1 : vector<16x64xf32>
    %5 = arith.mulf %3, %3 : vector<16x64xf32>
    %6 = arith.mulf %1, %3 : vector<16x64xf32>
    %7 = tpu.concatenate %1, %3, %4, %5, %6 in 0 : vector<16x64xf32>, vector<16x64xf32>, vector<16x64xf32>, vector<16x64xf32>, vector<16x64xf32> -> vector<80x64xf32>
    %c0_5 = arith.constant 0 : index
    %c0_6 = arith.constant 0 : index
    %8 = vector.load %arg4[%c0_5, %c0_6] : memref<64x64xf32, #tpu.memory_space<vmem>>, vector<64x64xf32>
    %cst = arith.constant dense<0.000000e+00> : vector<80x64xf32>
    %9 = tpu.matmul %7, %8, %cst {dimension_numbers = #tpu.dot_dimension_numbers<[1], [0], [0], [1], [0, 0, 1, 1], [], []>} : vector<80x64xf32>, vector<64x64xf32>, vector<80x64xf32> -> vector<80x64xf32>
    %c0_7 = arith.constant 0 : index
    %c0_8 = arith.constant 0 : index
    %10 = vector.load %arg3[%c0_7, %c0_8] : memref<80x80xf32, #tpu.memory_space<vmem>>, vector<80x80xf32>
    %cst_9 = arith.constant dense<0.000000e+00> : vector<80x64xf32>
    %11 = tpu.matmul %10, %9, %cst_9 {dimension_numbers = #tpu.dot_dimension_numbers<[1], [0], [0], [1], [0, 0, 1, 1], [], []>} : vector<80x80xf32>, vector<80x64xf32>, vector<80x64xf32> -> vector<80x64xf32>
    %12 = vector.extract_strided_slice %11 {offsets = [0, 0], sizes = [16, 64], strides = [1, 1]} : vector<80x64xf32> to vector<16x64xf32>
    %13 = vector.extract_strided_slice %11 {offsets = [16, 0], sizes = [16, 64], strides = [1, 1]} : vector<80x64xf32> to vector<16x64xf32>
    %14 = vector.extract_strided_slice %11 {offsets = [32, 0], sizes = [16, 64], strides = [1, 1]} : vector<80x64xf32> to vector<16x64xf32>
    %15 = vector.extract_strided_slice %11 {offsets = [48, 0], sizes = [16, 64], strides = [1, 1]} : vector<80x64xf32> to vector<16x64xf32>
    %16 = vector.extract_strided_slice %11 {offsets = [64, 0], sizes = [16, 64], strides = [1, 1]} : vector<80x64xf32> to vector<16x64xf32>
    %17 = arith.mulf %12, %12 : vector<16x64xf32>
    %18 = arith.mulf %13, %13 : vector<16x64xf32>
    %19 = arith.mulf %12, %13 : vector<16x64xf32>
    %20 = arith.subf %14, %17 : vector<16x64xf32>
    %21 = arith.subf %15, %18 : vector<16x64xf32>
    %22 = arith.subf %16, %19 : vector<16x64xf32>
    %cst_10 = arith.constant 2.000000e+00 : f32
    %23 = vector.broadcast %cst_10 : f32 to vector<16x64xf32>
    %24 = arith.mulf %23, %19 : vector<16x64xf32>
    %cst_11 = arith.constant 9.99999974E-5 : f32
    %25 = vector.broadcast %cst_11 : f32 to vector<16x64xf32>
    %26 = arith.addf %24, %25 : vector<16x64xf32>
    %cst_12 = arith.constant 2.000000e+00 : f32
    %27 = vector.broadcast %cst_12 : f32 to vector<16x64xf32>
    %28 = arith.mulf %27, %22 : vector<16x64xf32>
    %cst_13 = arith.constant 8.99999984E-4 : f32
    %29 = vector.broadcast %cst_13 : f32 to vector<16x64xf32>
    %30 = arith.addf %28, %29 : vector<16x64xf32>
    %31 = arith.mulf %26, %30 : vector<16x64xf32>
    %32 = arith.addf %17, %18 : vector<16x64xf32>
    %cst_14 = arith.constant 9.99999974E-5 : f32
    %33 = vector.broadcast %cst_14 : f32 to vector<16x64xf32>
    %34 = arith.addf %32, %33 : vector<16x64xf32>
    %35 = arith.addf %20, %21 : vector<16x64xf32>
    %cst_15 = arith.constant 8.99999984E-4 : f32
    %36 = vector.broadcast %cst_15 : f32 to vector<16x64xf32>
    %37 = arith.addf %35, %36 : vector<16x64xf32>
    %38 = arith.mulf %34, %37 : vector<16x64xf32>
    %39 = arith.divf %31, %38 : vector<16x64xf32>
    %cst_16 = arith.constant dense<0.000000e+00> : vector<64xf32>
    %40 = vector.multi_reduction <add>, %39, %cst_16 [0] : vector<16x64xf32> to vector<64xf32>
    %41 = vector.shape_cast %40 : vector<64xf32> to vector<1x64xf32>
    %c0_17 = arith.constant 0 : index
    %c0_18 = arith.constant 0 : index
    %c0_19 = arith.constant 0 : index
    %42 = vector.load %arg5[%c0_17, %c0_18, %c0_19] : memref<1x1x64xf32, #tpu.memory_space<vmem>>, vector<1x1x64xf32>
    %43 = vector.shape_cast %42 : vector<1x1x64xf32> to vector<1x64xf32>
    %44 = vector.shape_cast %41 : vector<1x64xf32> to vector<1x1x64xf32>
    tpu.vector_store %arg5[%c0_17, %c0_18, %c0_19], %44 {strides = array<i32>} : memref<1x1x64xf32, #tpu.memory_space<vmem>>, vector<1x1x64xf32>,
    return
  }
  func.func @transform_0(%arg0: i32) -> (i32, i32, i32) {
    %c0_i32 = arith.constant 0 : i32
    %c0_i32_0 = arith.constant 0 : i32
    %c0_i32_1 = arith.constant 0 : i32
    return %arg0, %c0_i32, %c0_i32_0 : i32, i32, i32
  }
  func.func @transform_1(%arg0: i32) -> (i32, i32, i32) {
    %c0_i32 = arith.constant 0 : i32
    %c0_i32_0 = arith.constant 0 : i32
    %c0_i32_1 = arith.constant 0 : i32
    return %arg0, %c0_i32, %c0_i32_0 : i32, i32, i32
  }
  func.func @transform_2(%arg0: i32) -> (i32, i32) {
    %c0_i32 = arith.constant 0 : i32
    %c0_i32_0 = arith.constant 0 : i32
    %c0_i32_1 = arith.constant 0 : i32
    return %c0_i32, %c0_i32_0 : i32, i32
  }
  func.func @transform_3(%arg0: i32) -> (i32, i32) {
    %c0_i32 = arith.constant 0 : i32
    %c0_i32_0 = arith.constant 0 : i32
    %c0_i32_1 = arith.constant 0 : i32
    return %c0_i32, %c0_i32_0 : i32, i32
  }
  func.func @transform_4(%arg0: i32) -> (i32, i32, i32) {
    %c0_i32 = arith.constant 0 : i32
    %c0_i32_0 = arith.constant 0 : i32
    %c0_i32_1 = arith.constant 0 : i32
    return %arg0, %c0_i32, %c0_i32_0 : i32, i32, i32
  }
}

</mosaic_0001>

<bundles_post_ra>
// kernel: squeeze.1
= control target key start
LH: loop header
LB: loop body
LE: loop exit
PB: predicated region body
PF: predicated region fallthrough
CT: control target
= control target key end

     0   :  { %s34_s8 = smov 80   ;;  %s35_s9 = smov 96   ;;  %vm7_vm0 = vcmask 130048   ;;  %s61_s0 = inlined_call_operand.vmem [shape: f32[2,64], index: 0, kind: input, shape index: {}]   ;;  %s62_s1 = inlined_call_operand.vmem [shape: f32[8,16], index: 1, kind: output, shape index: {}]  }
   0x1   :  { %v4_v0 = vld [vmem:[%s61_s0] sm:$0x3]  ;;  %s33_s0 = smov 112  }
   0x2   :  { %5 = vst [vmem:[#allocation0] sm:$0x3] %v4_v0 }
   0x9   :  { %v9_v1 = vld [vmem:[#allocation0] sm:$0x3]  }
   0xa   :  { %v21_v2 = vld [vmem:[#allocation0] sm:$0x3]   ;;  %10 = vrot.lane.b32.xlu0 %v9_v1, %s33_s0 }
   0xb   :  { %22 = vrot.lane.b32.xlu1 %v21_v2, %s34_s8  ;;  %v15_v3 = vld [vmem:[#allocation0] sm:$0x3]  }
   0xc   :  { %v6_v4 = vld [vmem:[#allocation0] sm:$0x3]  }
   0xd   :  { %8 = vst.msk [vmem:[%s62_s1] ss:$4 sm:$0x3] %vm7_vm0, %v6_v4  }
  0x12   :  { %16 = vrot.lane.b32.xlu0 %v15_v3, %s35_s9 }
  0x7c   :  { %v11_v5 = vpop.permute.xlu0 %10  }
  0x7d   :  { %v23_v6 = vpop.permute.xlu1 %22   ;;  %27 = vst.msk [vmem:[%s62_s1 + $0x1] ss:$4 sm:$0x3] %vm7_vm0, %v11_v5  }
  0x7e   :  { %29 = vst.msk [vmem:[%s62_s1 + $0x3] ss:$4 sm:$0x3] %vm7_vm0, %v23_v6  }
  0x84   :  { %v17_v7 = vpop.permute.xlu0 %16  }
  0x85   :  { %28 = vst.msk [vmem:[%s62_s1 + $0x2] ss:$4 sm:$0x3] %vm7_vm0, %v17_v7  }

// kernel: ssim_pallas.1
= control target key start
LH: loop header
LB: loop body
LE: loop exit
PB: predicated region body
PF: predicated region fallthrough
CT: control target
= control target key end

     0   :  { %s626_s15 = smov 0   ;;  %s726_s0 = inlined_call_operand.vmem [shape: f32[2,16,64], index: 0, kind: input, shape index: {}]   ;;  %s727_s1 = inlined_call_operand.vmem [shape: f32[2,16,64], index: 1, kind: input, shape index: {}]   ;;  %s728_s2 = inlined_call_operand.vmem [shape: f32[80,80], index: 2, kind: input, shape index: {}]   ;;  %s729_s3 = inlined_call_operand.vmem [shape: f32[64,64], index: 3, kind: input, shape index: {}]   ;;  %s730_s4 = inlined_call_operand.vmem [shape: f32[2,1,64], index: 4, kind: output, shape index: {}]  }
   0x1 LB: > { %s530_s16 = sadd.s32 4294967295, %s599_s15   ;;  %p534_p0 = scmp.ge.s32.totalorder %s599_s15, 1  ;;  %s599_s15 = sphi %s626_s15, %s14_s15  }
   0x2   : > { %p172_p1 = scmp.lt.s32.totalorder %s599_s15, 3 }
   0x4   : > { %p173_p2 = pnand %p534_p0, %p172_p1 }
   0x5   : > { %p201_p3 = scmp.lt.s32.totalorder (!%p173_p2), %s530_s16, 1 }
   0x6   : > { %176 = sbr.rel (%p173_p2) target bundleno = 405 (0x195), region = 36 }
   0xb   : > { %v231_v0 = vld [vmem:[%s729_s3 + $0x38] sm:$0xff]  ;;  %v230_v1 = vld [vmem:[%s729_s3 + $0x30] sm:$0xff]  ;;  %v229_v2 = vld [vmem:[%s729_s3 + $0x28] sm:$0xff]  ;;  %s732_s16 = smov (!%p201_p3, %s530_s16), 1  ;;  %vm232_vm0 = vcmask 523264   ;;  %vm320_vm1 = vcmask 654336  }
   0xc   : > { %271 = vmatpush.msra.mxu0 %v231_v0  ;;  %563 = vmatpush.msra.mxu3 %v231_v0  ;;  %v228_v3 = vld [vmem:[%s729_s3 + $0x20] sm:$0xff]  ;;  %s561_s25 = sshll.u32 %s732_s16, 4  ;;  %v227_v4 = vld [vmem:[%s729_s3 + $0x18] sm:$0xff]  ;;  %v226_v5 = vld [vmem:[%s729_s3 + $0x10] sm:$0xff]  ;;  %s213_s12 = scalar_lea.vmem %s730_s4, %s732_s16  ;;  %vm469_vm10 = vcmask 516096  }
   0xd   : > { %s210_s30 = scalar_lea.vmem %s727_s1, %s561_s25  ;;  %v225_v7 = vld [vmem:[%s729_s3 + $0x8] sm:$0xff]  ;;  %s205_s11 = scalar_lea.vmem %s726_s0, %s561_s25  ;;  %v224_v8 = vld [vmem:[%s729_s3] sm:$0xff]  ;;  %v316_v31 = vld [vmem:[%s728_s2 + $0x30] sm:$0xff] }
   0xe   : > { %272 = vmatpush.msra.mxu0 %v230_v1  ;;  %564 = vmatpush.msra.mxu3 %v230_v1  ;;  %v216_v6 = vld [vmem:[%s210_s30] sm:$0xff]  ;;  %v217_v11 = vld [vmem:[%s210_s30 + $0x8] sm:$0xff]  ;;  %v312_v32 = vld [vmem:[%s728_s2 + $0x10] sm:$0xff] }
   0xf   : > { %v220_v9 = vmul.f32 %v216_v6, %v216_v6  ;;  %v214_v10 = vld [vmem:[%s205_s11] sm:$0xff]  ;;  %v221_v12 = vmul.f32 %v217_v11, %v217_v11  ;;  %v215_v13 = vld [vmem:[%s205_s11 + $0x8] sm:$0xff]  ;;  %v317_v33 = vld [vmem:[%s728_s2 + $0x38] sm:$0xff] }
  0x10   : > { %273 = vmatpush.msra.mxu0 %v229_v2  ;;  %565 = vmatpush.msra.mxu3 %v229_v2  ;;  %v222_v14 = vmul.f32 %v216_v6, %v214_v10  ;;  %v223_v15 = vmul.f32 %v217_v11, %v215_v13  ;;  %v218_v16 = vmul.f32 %v214_v10, %v214_v10  ;;  %v310_v28 = vld [vmem:[%s728_s2] sm:$0xff]  ;;  %v315_v29 = vld [vmem:[%s728_s2 + $0x28] sm:$0xff]  ;;  %v313_v34 = vld [vmem:[%s728_s2 + $0x18] sm:$0xff] }
  0x11   : > { %v219_v17 = vmul.f32 %v215_v13, %v215_v13  ;;  %v311_v30 = vld [vmem:[%s728_s2 + $0x8] sm:$0xff]  ;;  %v318_v35 = vld [vmem:[%s728_s2 + $0x40] sm:$0xff] }
  0x12   : > { %274 = vmatpush.msra.mxu0 %v228_v3  ;;  %566 = vmatpush.msra.mxu3 %v228_v3  ;;  %v314_v36 = vld [vmem:[%s728_s2 + $0x20] sm:$0xff]  ;;  %v319_v37 = vld [vmem:[%s728_s2 + $0x48] sm:$0xff] }
  0x14   : > { %275 = vmatpush.msra.mxu0 %v227_v4  ;;  %567 = vmatpush.msra.mxu3 %v227_v4 }
  0x16   : > { %276 = vmatpush.msra.mxu0 %v226_v5  ;;  %568 = vmatpush.msra.mxu3 %v226_v5 }
  0x18   : > { %277 = vmatpush.msra.mxu0 %v225_v7  ;;  %569 = vmatpush.msra.mxu3 %v225_v7 }
  0x1a   : > { %278 = vmatpush.msra.mxu0 %v224_v8  ;;  %570 = vmatpush.msra.mxu3 %v224_v8 }
  0x1b   : > { %539 = vmatmul.msk.f32.vlgmr.msra.gmra.mxu0 %vm232_vm0, %v214_v10  ;;  %545 = vmatmul.msk.f32.vlgmr.msra.gmra.mxu3 %vm232_vm0, %v220_v9 }
  0x23   : > { %540 = vmatmul.msk.f32.gmra.mxu0 %vm232_vm0, %v215_v13  ;;  %546 = vmatmul.msk.f32.gmra.mxu3 %vm232_vm0, %v221_v12 }
  0x2b   : > { %541 = vmatmul.msk.f32.gmra.mxu0 %vm232_vm0, %v216_v6  ;;  %547 = vmatmul.msk.f32.gmra.mxu3 %vm232_vm0, %v222_v14 }
  0x33   : > { %542 = vmatmul.msk.f32.gmra.mxu0 %vm232_vm0, %v217_v11  ;;  %548 = vmatmul.msk.f32.gmra.mxu3 %vm232_vm0, %v223_v15 }
  0x3b   : > { %543 = vmatmul.msk.f32.gmra.mxu0 %vm232_vm0, %v218_v16 }
  0x43   : > { %544 = vmatmul.msk.f32.gmra.mxu0 %vm232_vm0, %v219_v17 }
  0x98   : > { %v280_v18 = vpop.f32.mrf.mxu0 }
  0x9e   : > { %v298_v19 = vpop.f32.mrf.mxu3 }
  0xa0   : > { %v283_v20 = vpop.f32.mrf.mxu0 }
  0xa6   : > { %v301_v21 = vpop.f32.mrf.mxu3 }
  0xa8   : > { %v286_v22 = vpop.f32.mrf.mxu0 }
  0xae   : > { %v304_v23 = vpop.f32.mrf.mxu3 }
  0xb0   : > { %v289_v24 = vpop.f32.mrf.mxu0 }
  0xb6   : > { %v307_v25 = vpop.f32.mrf.mxu3 }
  0xb7   : > { %357 = vmatpush.msra.mxu1 %v307_v25  ;;  %571 = vmatpush.msra.mxu2 %v307_v25 }
  0xb8   : > { %v292_v26 = vpop.f32.mrf.mxu0 }
  0xb9   : > { %358 = vmatpush.msra.mxu1 %v304_v23  ;;  %572 = vmatpush.msra.mxu2 %v304_v23 }
  0xbb   : > { %359 = vmatpush.msra.mxu1 %v301_v21  ;;  %573 = vmatpush.msra.mxu2 %v301_v21 }
  0xbd   : > { %360 = vmatpush.msra.mxu1 %v298_v19  ;;  %574 = vmatpush.msra.mxu2 %v298_v19 }
  0xc0   : > { %v295_v27 = vpop.f32.mrf.mxu0 }
  0xc1   : > { %361 = vmatpush.msra.mxu1 %v295_v27  ;;  %575 = vmatpush.msra.mxu2 %v295_v27 }
  0xc3   : > { %362 = vmatpush.msra.mxu1 %v292_v26  ;;  %576 = vmatpush.msra.mxu2 %v292_v26 }
  0xc5   : > { %363 = vmatpush.msra.mxu1 %v289_v24  ;;  %577 = vmatpush.msra.mxu2 %v289_v24 }
  0xc7   : > { %364 = vmatpush.msra.mxu1 %v286_v22  ;;  %578 = vmatpush.msra.mxu2 %v286_v22 }
  0xc9   : > { %365 = vmatpush.msra.mxu1 %v283_v20  ;;  %579 = vmatpush.msra.mxu2 %v283_v20 }
  0xcb   : > { %366 = vmatpush.msra.mxu1 %v280_v18  ;;  %580 = vmatpush.msra.mxu2 %v280_v18 }
  0xcc   : > { %549 = vmatmul.msk.f32.vlgmr.msra.gmra.mxu1 %vm320_vm1, %v310_v28  ;;  %554 = vmatmul.msk.f32.vlgmr.msra.gmra.mxu2 %vm320_vm1, %v315_v29 }
  0xd4   : > { %550 = vmatmul.msk.f32.gmra.mxu1 %vm320_vm1, %v311_v30  ;;  %555 = vmatmul.msk.f32.gmra.mxu2 %vm320_vm1, %v316_v31 }
  0xdc   : > { %551 = vmatmul.msk.f32.gmra.mxu1 %vm320_vm1, %v312_v32  ;;  %556 = vmatmul.msk.f32.gmra.mxu2 %vm320_vm1, %v317_v33 }
  0xe4   : > { %552 = vmatmul.msk.f32.gmra.mxu1 %vm320_vm1, %v313_v34  ;;  %557 = vmatmul.msk.f32.gmra.mxu2 %vm320_vm1, %v318_v35 }
  0xec   : > { %553 = vmatmul.msk.f32.gmra.mxu1 %vm320_vm1, %v314_v36  ;;  %558 = vmatmul.msk.f32.gmra.mxu2 %vm320_vm1, %v319_v37 }
 0x149   : > { %v368_v38 = vpop.f32.mrf.mxu1 }
 0x14a   : > { %v398_v53 = vmul.f32 %v368_v38, %v368_v38 }
 0x14f   : > { %v383_v39 = vpop.f32.mrf.mxu2 }
 0x151   : > { %v371_v40 = vpop.f32.mrf.mxu1 }
 0x152   : > { %v399_v44 = vmul.f32 %v371_v40, %v371_v40 }
 0x154   : > { %v405_v47 = vsub.f32 %v383_v39, %v399_v44 }
 0x157   : > { %v386_v41 = vpop.f32.mrf.mxu2 }
 0x159   : > { %v374_v42 = vpop.f32.mrf.mxu1 }
 0x15a   : > { %v400_v50 = vmul.f32 %v374_v42, %v374_v42  ;;  %v402_v4 = vmul.f32 %v374_v42, %v368_v38 }
 0x15c   : > { %v406_v57 = vsub.f32 %v386_v41, %v400_v50  ;;  %v420_v58 = vadd.f32 %v400_v50, %v398_v53  ;;  %v410_v18 = vmul.f32 2.0, %v402_v4 }
 0x15e   : > { %v422_v62 = vadd.f32 0.0001, %v420_v58  ;;  %v412_v29 = vadd.f32 0.0001, %v410_v18 }
 0x15f   : > { %v389_v43 = vpop.f32.mrf.mxu2 }
 0x161   : > { %v377_v45 = vpop.f32.mrf.mxu1 }
 0x162   : > { %v401_v46 = vmul.f32 %v377_v45, %v377_v45  ;;  %v403_v2 = vmul.f32 %v377_v45, %v371_v40 }
 0x164   : > { %v407_v48 = vsub.f32 %v389_v43, %v401_v46  ;;  %v421_v49 = vadd.f32 %v401_v46, %v399_v44  ;;  %v411_v12 = vmul.f32 2.0, %v403_v2 }
 0x166   : > { %v425_v51 = vadd.f32 %v407_v48, %v405_v47  ;;  %v423_v54 = vadd.f32 0.0001, %v421_v49  ;;  %v413_v22 = vadd.f32 0.0001, %v411_v12 }
 0x167   : > { %v392_v52 = vpop.f32.mrf.mxu2 }
 0x168   : > { %v427_v55 = vadd.f32 0.0009, %v425_v51  ;;  %v408_v7 = vsub.f32 %v392_v52, %v402_v4 }
 0x169   : > { %v380_v56 = vpop.f32.mrf.mxu1 }
 0x16a   : > { %v429_v59 = vmul.f32 %v427_v55, %v423_v54  ;;  %v404_v60 = vsub.f32 %v380_v56, %v398_v53  ;;  %v414_v13 = vmul.f32 2.0, %v408_v7 }
 0x16c   : > { %589 = vrcp.f32 %v429_v59  ;;  %v424_v61 = vadd.f32 %v406_v57, %v404_v60  ;;  %v456_v14 = vand.u32 2147483648, %v429_v59  ;;  %vm450_vm3 = vweird.f32 %v429_v59 }
 0x16d   : > { %v454_v17 = vand.u32 2147483647, %v429_v59  ;;  %v416_v23 = vadd.f32 0.0009, %v414_v13 }
 0x16e   : > { %v426_v63 = vadd.f32 0.0009, %v424_v61  ;;  %v457_v25 = vor.u32 1.1754944e-38, %v456_v14 }
 0x16f   : > { %v395_v1 = vpop.f32.mrf.mxu2  ;;  %vm455_vm6 = vcmp.eq.f32.partialorder %v454_v17, 8.507059e+37  ;;  %v418_v33 = vmul.f32 %v416_v23, %v412_v29 }
 0x170   : > { %v428_v0 = vmul.f32 %v426_v63, %v422_v62  ;;  %v409_v5 = vsub.f32 %v395_v1, %v403_v2 }
 0x172   : > { %v590_v3 = vpop.eup %589  ;;  %591 = vrcp.f32 %v428_v0  ;;  %v415_v9 = vmul.f32 2.0, %v409_v5  ;;  %v441_v24 = vand.u32 2147483648, %v428_v0  ;;  %v439_v27 = vand.u32 2147483647, %v428_v0 }
 0x173   : > { %v446_v6 = vmul.f32 %v590_v3, %v429_v59  ;;  %vm451_vm2 = vweird.f32 %v590_v3  ;;  %vm435_vm7 = vweird.f32 %v428_v0 }
 0x174   : > { %vm452_vm4 = vmor %vm450_vm3, %vm451_vm2  ;;  %v417_v20 = vadd.f32 0.0009, %v415_v9  ;;  %v442_v32 = vor.u32 1.1754944e-38, %v441_v24  ;;  %vm440_vm9 = vcmp.eq.f32.partialorder %v439_v27, 8.507059e+37 }
 0x175   : > { %v447_v8 = vsub.f32 1.0, %v446_v6 }
 0x176   : > { %v419_v30 = vmul.f32 %v417_v20, %v413_v22 }
 0x177   : > { %v448_v10 = vmul.f32 %v590_v3, %v447_v8 }
 0x178   : > { %v592_v11 = vpop.eup %591 }
 0x179   : > { %v431_v15 = vmul.f32 %v592_v11, %v428_v0  ;;  %v449_v16 = vadd.f32 %v590_v3, %v448_v10  ;;  %vm436_vm5 = vweird.f32 %v592_v11 }
 0x17a   : > { %vm437_vm8 = vmor %vm435_vm7, %vm436_vm5 }
 0x17b   : > { %v432_v19 = vsub.f32 1.0, %v431_v15  ;;  %v453_v21 = vsel %vm452_vm4, %v590_v3, %v449_v16 }
 0x17c   : > { %v458_v28 = vsel %vm455_vm6, %v457_v25, %v453_v21 }
 0x17d   : > { %v433_v26 = vmul.f32 %v592_v11, %v432_v19  ;;  %v459_v35 = vmul.f32 %v458_v28, %v419_v30 }
 0x17f   : > { %v434_v31 = vadd.f32 %v592_v11, %v433_v26  ;;  %v461_v39 = vsel %vm232_vm0, %v459_v35, 0.0 }
 0x181   : > { %v438_v34 = vsel %vm437_vm8, %v592_v11, %v434_v31 }
 0x182   : > { %v443_v36 = vsel %vm440_vm9, %v442_v32, %v438_v34 }
 0x183   : > { %v444_v37 = vmul.f32 %v443_v36, %v418_v33 }
 0x185   : > { %v460_v38 = vsel %vm232_vm0, %v444_v37, 0.0 }
 0x186   : > { %v462_v40 = vadd.f32 %v461_v39, %v460_v38 }
 0x188   : > { %v463_v41 = vrot.slane %v462_v40, 4 }
 0x18a   : > { %v464_v42 = vadd.f32 %v463_v41, %v462_v40 }
 0x18c   : > { %v465_v43 = vrot.slane %v464_v42, 2 }
 0x18e   : > { %v466_v44 = vadd.f32 %v465_v43, %v464_v42 }
 0x190   : > { %v467_v45 = vrot.slane %v466_v44, 1 }
 0x192   : > { %v468_v46 = vadd.f32 %v467_v45, %v466_v44 }
 0x194   : > { %470 = vst.msk [vmem:[%s213_s12] sm:$0x1] %vm469_vm10, %v468_v46 }
 0x195 PF: > { %s14_s15 = sadd.s32 1, %s599_s15  }
 0x196   : > { %p11_p4 = scmp.ge.s32.totalorder %s14_s15, 4  }
 0x198   :  { %13 = sbr.rel (!%p11_p4) target bundleno = 1 (0x1), region = 69 }

</bundles_post_ra>
